<compile_context>
chip_gen: v7x
topology: tpu7x:2x2x1
jax: 0.10.0
libtpu: 0.0.40
codegen_flags: <defaults>
</compile_context>

<pallas_src>
import jax
import jax.numpy as jnp
from jax.experimental import pallas as pl
from jax.experimental.pallas import tpu as pltpu


def _node_trans_kernel(node_id_ref, pre_node_id_ref,        # SMEM index vectors (n_sel,)
                       feat_in, img_in, kg_in, all_in,      # (N,1,W) node-data tables
                       all_node_ref, params_ref,            # (T_all,H), (H+3,mid)
                       feat_out, img_out, kg_out, all_out,  # aliased, updated in place
                       cur_h_s, cur_maps_s, pre_maps_s):    # VMEM scratch
    n_sel = cur_h_s.shape[0]
    hdim = feat_in.shape[-1]
    t_img = img_in.shape[-1]

    # Carry the full tables through to the (aliased) outputs; only the selected rows get
    # overwritten below.  Replaces four full-table .at[].set() copies XLA would otherwise
    # emit outside the kernel.
    feat_out[...] = feat_in[...]
    img_out[...] = img_in[...]
    kg_out[...] = kg_in[...]
    all_out[...] = all_in[...]

    # ---- gather selected rows (read the INPUT refs: no dependency on the copies above;
    # all reads happen before any scatter write, matching the PyTorch module even if
    # node_id / pre_node_id overlap).
    for i in range(n_sel):
        nid = node_id_ref[i]
        pid = pre_node_id_ref[i]
        cur_h_s[i:i + 1, :] = feat_in[nid].astype(jnp.float32)
        cur_maps_s[i:i + 1, 0:t_img] = img_in[nid].astype(jnp.float32)
        cur_maps_s[i:i + 1, t_img:] = kg_in[nid].astype(jnp.float32)
        pre_maps_s[i:i + 1, 0:t_img] = img_in[pid].astype(jnp.float32)
        pre_maps_s[i:i + 1, t_img:] = kg_in[pid].astype(jnp.float32)

    # ---- gate = sigmoid(MLP(current_hidden)):  Linear(H,mid) -> ReLU -> Linear(mid,1)
    h = cur_h_s[...]                                        # (n_sel, H) f32
    w1 = params_ref[0:hdim, :]                              # (H, mid)
    b1 = params_ref[hdim:hdim + 1, :]                       # (1, mid)
    w2_row = params_ref[hdim + 1:hdim + 2, :]               # (1, mid) == w2.T
    b2 = params_ref[hdim + 2:hdim + 3, 0:1]                 # (1, 1)
    hid = jnp.maximum(jnp.dot(h, w1, preferred_element_type=jnp.float32) + b1, 0.0)
    # (n,mid)@(mid,1) would waste an MXU pass for one valid lane -> VPU mul + lane reduce.
    logit = jnp.sum(hid * w2_row, axis=-1, keepdims=True) + b2
    gate = jax.nn.sigmoid(logit)                            # (n_sel, 1)

    # ---- gated mixing of the concatenated [img | kg] maps, then joint softmax (dim=1).
    pre_maps = pre_maps_s[...]
    new_maps = pre_maps + gate * (cur_maps_s[...] - pre_maps)            # (n_sel, T_all)
    m = jnp.max(new_maps, axis=-1, keepdims=True)
    e = jnp.exp(new_maps - m)
    inv = pl.reciprocal(jnp.sum(e, axis=-1, keepdims=True), approx=True)  # EUP
    p = e * inv                                             # softmax([img|kg], dim=1)

    # ---- new_feat = new_all_map @ [img_graph_feat ; kg_graph_feat]  (single MXU dot).
    # TODO(synk): the PyTorch source writes torch.cat(..., dim=1) for all_node, but only
    # the node-axis concat (dim=0) type-checks against this matmul; that is what we do.
    new_feat = jnp.dot(p, all_node_ref[...], preferred_element_type=jnp.float32)

    # ---- scatter the updated rows back into the in-place tables.
    for i in range(n_sel):
        nid = node_id_ref[i]
        img_out[nid] = new_maps[i:i + 1, 0:t_img].astype(img_out.dtype)
        kg_out[nid] = new_maps[i:i + 1, t_img:].astype(kg_out.dtype)
        all_out[nid] = p[i:i + 1, :].astype(all_out.dtype)
        feat_out[nid] = new_feat[i:i + 1, :].astype(feat_out.dtype)


def _pack_mlp_params(w1, b1, w2, b2):
    """Pack Linear(H,mid) -> ReLU -> Linear(mid,1) params into one (H+3, mid) f32 buffer."""
    hdim, mid = w1.shape
    b1_row = jnp.reshape(b1, (1, mid)).astype(jnp.float32)
    w2_row = jnp.reshape(w2, (1, mid)).astype(jnp.float32)   # (mid,1) -> (1,mid)
    b2_row = jnp.concatenate(
        [jnp.reshape(b2, (1, 1)).astype(jnp.float32),
         jnp.zeros((1, mid - 1), jnp.float32)], axis=1)
    return jnp.concatenate([w1.astype(jnp.float32), b1_row, w2_row, b2_row], axis=0)


@jax.jit
def node_trans(feat, img_map, kg_map, all_map, node_id, pre_node_id,
               img_node_feat, kg_node_feat, params):
    """Full NodeTrans forward: gather, compute and scatter fused in one Pallas kernel.
    Rows not listed in node_id pass through the tables unchanged."""
    num_nodes, hdim = feat.shape
    n_sel = node_id.shape[0]
    t_img = img_map.shape[1]
    t_kg = kg_map.shape[1]
    t_all = t_img + t_kg
    assert all_map.shape == (num_nodes, t_all)

    # Concatenate the two graphs' node features once -> single attention matmul.
    all_node = jnp.concatenate([img_node_feat, kg_node_feat], axis=0).astype(jnp.float32)
    packed = _pack_mlp_params(params["w1"], params["b1"], params["w2"], params["b2"])

    # Tables as (num_nodes, 1, W): dynamic row indexing lands on the untiled leading axis.
    feat3 = feat.reshape(num_nodes, 1, hdim)
    img3 = img_map.reshape(num_nodes, 1, t_img)
    kg3 = kg_map.reshape(num_nodes, 1, t_kg)
    all3 = all_map.reshape(num_nodes, 1, t_all)

    smem = pl.BlockSpec(memory_space=pltpu.MemorySpace.SMEM)
    vmem = pl.BlockSpec(memory_space=pltpu.MemorySpace.VMEM)

    out_shapes = (
        jax.ShapeDtypeStruct(feat3.shape, feat3.dtype),
        jax.ShapeDtypeStruct(img3.shape, img3.dtype),
        jax.ShapeDtypeStruct(kg3.shape, kg3.dtype),
        jax.ShapeDtypeStruct(all3.shape, all3.dtype),
    )
    feat_o, img_o, kg_o, all_o = pl.pallas_call(
        _node_trans_kernel,
        out_shape=out_shapes,
        in_specs=[smem, smem, vmem, vmem, vmem, vmem, vmem, vmem],
        out_specs=(vmem, vmem, vmem, vmem),
        scratch_shapes=[
            pltpu.VMEM((n_sel, hdim), jnp.float32),
            pltpu.VMEM((n_sel, t_all), jnp.float32),
            pltpu.VMEM((n_sel, t_all), jnp.float32),
        ],
        # In-place update of the node-data tables.  Call args are
        # (node_id, pre_node_id, feat3, img3, kg3, all3, all_node, packed) -> indices 2..5.
        input_output_aliases={2: 0, 3: 1, 4: 2, 5: 3},
    )(node_id, pre_node_id, feat3, img3, kg3, all3, all_node, packed)

    return (feat_o.reshape(num_nodes, hdim),
            img_o.reshape(num_nodes, t_img),
            kg_o.reshape(num_nodes, t_kg),
            all_o.reshape(num_nodes, t_all))


def node_trans_ref(feat, img_map, kg_map, all_map, node_id, pre_node_id,
                   img_node_feat, kg_node_feat, params):
    """Pure-JAX reference of the same forward semantics."""
    cur_h = feat[node_id]
    hid = jnp.maximum(cur_h @ params["w1"] + params["b1"], 0.0)
    gate = jax.nn.sigmoid(hid @ params["w2"] + params["b2"])
    new_img = img_map[node_id] * gate + (1.0 - gate) * img_map[pre_node_id]
    new_kg = kg_map[node_id] * gate + (1.0 - gate) * kg_map[pre_node_id]
    new_all = jax.nn.softmax(jnp.concatenate([new_img, new_kg], axis=1), axis=1)
    all_node = jnp.concatenate([img_node_feat, kg_node_feat], axis=0)
    new_feat = new_all @ all_node
    return (feat.at[node_id].set(new_feat),
            img_map.at[node_id].set(new_img),
            kg_map.at[node_id].set(new_kg),
            all_map.at[node_id].set(new_all))


if __name__ == "__main__":
    key = jax.random.PRNGKey(0)
    ks = jax.random.split(key, 8)

    hidden_size = 32      # H (also feature dim of img/kg graph nodes)
    mid_size = 16         # MLP mid
    num_nodes = 8         # nodes in reasoning graph r_g
    n_img = 16            # nodes in img_graph
    n_kg = 16             # nodes in kg_graph

    # r_g node data
    feat = jax.random.normal(ks[0], (num_nodes, hidden_size), jnp.float32)
    img_map = jax.nn.softmax(jax.random.normal(ks[1], (num_nodes, n_img), jnp.float32), -1)
    kg_map = jax.nn.softmax(jax.random.normal(ks[2], (num_nodes, n_kg), jnp.float32), -1)
    all_map = jnp.zeros((num_nodes, n_img + n_kg), jnp.float32)

    # img_graph / kg_graph node features
    img_node_feat = jax.random.normal(ks[3], (n_img, hidden_size), jnp.float32)
    kg_node_feat = jax.random.normal(ks[4], (n_kg, hidden_size), jnp.float32)

    # selected node ids
    node_id = jnp.array([1, 3, 5, 7], jnp.int32)
    pre_node_id = jnp.array([0, 2, 4, 6], jnp.int32)

    # MLP parameters (Linear(H, mid) -> ReLU -> Linear(mid, 1)), deterministic init
    params = {
        "w1": jax.random.normal(ks[5], (hidden_size, mid_size), jnp.float32) * 0.1,
        "b1": jnp.zeros((1, mid_size), jnp.float32),
        "w2": jax.random.normal(ks[6], (mid_size, 1), jnp.float32) * 0.1,
        "b2": jnp.zeros((1, 1), jnp.float32),
    }

    feat_o, img_o, kg_o, all_o = jax.block_until_ready(node_trans(
        feat, img_map, kg_map, all_map, node_id, pre_node_id,
        img_node_feat, kg_node_feat, params))

    # correctness vs pure-JAX reference (approx reciprocal -> loose tolerance)
    ref = node_trans_ref(feat, img_map, kg_map, all_map, node_id, pre_node_id,
                         img_node_feat, kg_node_feat, params)
    ok = True
    for got, want in zip((feat_o, img_o, kg_o, all_o), ref):
        ok = ok and bool(jnp.allclose(got, want, atol=2e-3, rtol=2e-3))
    # sanity: softmax rows of updated all_map sum to 1; untouched rows stay zero
    row_sums = jnp.sum(all_o[node_id], axis=-1)
    ok = ok and bool(jnp.all(jnp.abs(row_sums - 1.0) < 2e-3))
    ok = ok and bool(jnp.all(all_o[pre_node_id] == 0.0))
    assert ok
    print("KERNEL_OK")
</pallas_src>

<mosaic_0001>
module attributes {stable_mosaic.version = 11 : i64} {
  func.func @_node_trans_kernel(%arg0: memref<4xi32, #tpu.memory_space<smem>>, %arg1: memref<4xi32, #tpu.memory_space<smem>>, %arg2: memref<8x1x32xf32, #tpu.memory_space<vmem>>, %arg3: memref<8x1x16xf32, #tpu.memory_space<vmem>>, %arg4: memref<8x1x16xf32, #tpu.memory_space<vmem>>, %arg5: memref<8x1x32xf32, #tpu.memory_space<vmem>>, %arg6: memref<32x32xf32, #tpu.memory_space<vmem>>, %arg7: memref<35x16xf32, #tpu.memory_space<vmem>>, %arg8: memref<8x1x32xf32, #tpu.memory_space<vmem>>, %arg9: memref<8x1x16xf32, #tpu.memory_space<vmem>>, %arg10: memref<8x1x16xf32, #tpu.memory_space<vmem>>, %arg11: memref<8x1x32xf32, #tpu.memory_space<vmem>>, %arg12: memref<4x32xf32, #tpu.memory_space<vmem>>, %arg13: memref<4x32xf32, #tpu.memory_space<vmem>>, %arg14: memref<4x32xf32, #tpu.memory_space<vmem>>) attributes {dimension_semantics = [], scalar_prefetch = 0 : i64, scratch_operands = 3 : i64, tpu.core_type = #tpu.core_type<tc>} {
    %c0 = arith.constant 0 : index
    %c0_0 = arith.constant 0 : index
    %c0_1 = arith.constant 0 : index
    %0 = vector.load %arg2[%c0, %c0_0, %c0_1] : memref<8x1x32xf32, #tpu.memory_space<vmem>>, vector<8x1x32xf32>
    %c0_2 = arith.constant 0 : index
    %c0_3 = arith.constant 0 : index
    %c0_4 = arith.constant 0 : index
    %1 = vector.load %arg8[%c0_2, %c0_3, %c0_4] : memref<8x1x32xf32, #tpu.memory_space<vmem>>, vector<8x1x32xf32>
    tpu.vector_store %arg8[%c0_2, %c0_3, %c0_4], %0 {strides = array<i32>} : memref<8x1x32xf32, #tpu.memory_space<vmem>>, vector<8x1x32xf32>,
    %c0_5 = arith.constant 0 : index
    %c0_6 = arith.constant 0 : index
    %c0_7 = arith.constant 0 : index
    %2 = vector.load %arg3[%c0_5, %c0_6, %c0_7] : memref<8x1x16xf32, #tpu.memory_space<vmem>>, vector<8x1x16xf32>
    %c0_8 = arith.constant 0 : index
    %c0_9 = arith.constant 0 : index
    %c0_10 = arith.constant 0 : index
    %3 = vector.load %arg9[%c0_8, %c0_9, %c0_10] : memref<8x1x16xf32, #tpu.memory_space<vmem>>, vector<8x1x16xf32>
    tpu.vector_store %arg9[%c0_8, %c0_9, %c0_10], %2 {strides = array<i32>} : memref<8x1x16xf32, #tpu.memory_space<vmem>>, vector<8x1x16xf32>,
    %c0_11 = arith.constant 0 : index
    %c0_12 = arith.constant 0 : index
    %c0_13 = arith.constant 0 : index
    %4 = vector.load %arg4[%c0_11, %c0_12, %c0_13] : memref<8x1x16xf32, #tpu.memory_space<vmem>>, vector<8x1x16xf32>
    %c0_14 = arith.constant 0 : index
    %c0_15 = arith.constant 0 : index
    %c0_16 = arith.constant 0 : index
    %5 = vector.load %arg10[%c0_14, %c0_15, %c0_16] : memref<8x1x16xf32, #tpu.memory_space<vmem>>, vector<8x1x16xf32>
    tpu.vector_store %arg10[%c0_14, %c0_15, %c0_16], %4 {strides = array<i32>} : memref<8x1x16xf32, #tpu.memory_space<vmem>>, vector<8x1x16xf32>,
    %c0_17 = arith.constant 0 : index
    %c0_18 = arith.constant 0 : index
    %c0_19 = arith.constant 0 : index
    %6 = vector.load %arg5[%c0_17, %c0_18, %c0_19] : memref<8x1x32xf32, #tpu.memory_space<vmem>>, vector<8x1x32xf32>
    %c0_20 = arith.constant 0 : index
    %c0_21 = arith.constant 0 : index
    %c0_22 = arith.constant 0 : index
    %7 = vector.load %arg11[%c0_20, %c0_21, %c0_22] : memref<8x1x32xf32, #tpu.memory_space<vmem>>, vector<8x1x32xf32>
    tpu.vector_store %arg11[%c0_20, %c0_21, %c0_22], %6 {strides = array<i32>} : memref<8x1x32xf32, #tpu.memory_space<vmem>>, vector<8x1x32xf32>,
    %c0_23 = arith.constant 0 : index
    %8 = memref.load %arg0[%c0_23] : memref<4xi32, #tpu.memory_space<smem>>
    %c0_24 = arith.constant 0 : index
    %9 = memref.load %arg1[%c0_24] : memref<4xi32, #tpu.memory_space<smem>>
    %10 = arith.index_cast %8 : i32 to index
    %c0_25 = arith.constant 0 : index
    %c0_26 = arith.constant 0 : index
    %11 = vector.load %arg2[%10, %c0_25, %c0_26] : memref<8x1x32xf32, #tpu.memory_space<vmem>>, vector<1x1x32xf32>
    %12 = vector.shape_cast %11 : vector<1x1x32xf32> to vector<1x32xf32>
    %c0_27 = arith.constant 0 : index
    %c0_28 = arith.constant 0 : index
    %13 = vector.load %arg12[%c0_27, %c0_28] : memref<4x32xf32, #tpu.memory_space<vmem>>, vector<1x32xf32>
    tpu.vector_store %arg12[%c0_27, %c0_28], %12 {strides = array<i32>} : memref<4x32xf32, #tpu.memory_space<vmem>>, vector<1x32xf32>,
    %14 = arith.index_cast %8 : i32 to index
    %c0_29 = arith.constant 0 : index
    %c0_30 = arith.constant 0 : index
    %15 = vector.load %arg3[%14, %c0_29, %c0_30] : memref<8x1x16xf32, #tpu.memory_space<vmem>>, vector<1x1x16xf32>
    %16 = vector.shape_cast %15 : vector<1x1x16xf32> to vector<1x16xf32>
    %c0_31 = arith.constant 0 : index
    %c0_32 = arith.constant 0 : index
    %17 = vector.load %arg13[%c0_31, %c0_32] : memref<4x32xf32, #tpu.memory_space<vmem>>, vector<1x16xf32>
    tpu.vector_store %arg13[%c0_31, %c0_32], %16 {strides = array<i32>} : memref<4x32xf32, #tpu.memory_space<vmem>>, vector<1x16xf32>,
    %18 = arith.index_cast %8 : i32 to index
    %c0_33 = arith.constant 0 : index
    %c0_34 = arith.constant 0 : index
    %19 = vector.load %arg4[%18, %c0_33, %c0_34] : memref<8x1x16xf32, #tpu.memory_space<vmem>>, vector<1x1x16xf32>
    %20 = vector.shape_cast %19 : vector<1x1x16xf32> to vector<1x16xf32>
    %c0_35 = arith.constant 0 : index
    %c16 = arith.constant 16 : index
    %21 = vector.load %arg13[%c0_35, %c16] : memref<4x32xf32, #tpu.memory_space<vmem>>, vector<1x16xf32>
    tpu.vector_store %arg13[%c0_35, %c16], %20 {strides = array<i32>} : memref<4x32xf32, #tpu.memory_space<vmem>>, vector<1x16xf32>,
    %22 = arith.index_cast %9 : i32 to index
    %c0_36 = arith.constant 0 : index
    %c0_37 = arith.constant 0 : index
    %23 = vector.load %arg3[%22, %c0_36, %c0_37] : memref<8x1x16xf32, #tpu.memory_space<vmem>>, vector<1x1x16xf32>
    %24 = vector.shape_cast %23 : vector<1x1x16xf32> to vector<1x16xf32>
    %c0_38 = arith.constant 0 : index
    %c0_39 = arith.constant 0 : index
    %25 = vector.load %arg14[%c0_38, %c0_39] : memref<4x32xf32, #tpu.memory_space<vmem>>, vector<1x16xf32>
    tpu.vector_store %arg14[%c0_38, %c0_39], %24 {strides = array<i32>} : memref<4x32xf32, #tpu.memory_space<vmem>>, vector<1x16xf32>,
    %26 = arith.index_cast %9 : i32 to index
    %c0_40 = arith.constant 0 : index
    %c0_41 = arith.constant 0 : index
    %27 = vector.load %arg4[%26, %c0_40, %c0_41] : memref<8x1x16xf32, #tpu.memory_space<vmem>>, vector<1x1x16xf32>
    %28 = vector.shape_cast %27 : vector<1x1x16xf32> to vector<1x16xf32>
    %c0_42 = arith.constant 0 : index
    %c16_43 = arith.constant 16 : index
    %29 = vector.load %arg14[%c0_42, %c16_43] : memref<4x32xf32, #tpu.memory_space<vmem>>, vector<1x16xf32>
    tpu.vector_store %arg14[%c0_42, %c16_43], %28 {strides = array<i32>} : memref<4x32xf32, #tpu.memory_space<vmem>>, vector<1x16xf32>,
    %c1 = arith.constant 1 : index
    %30 = memref.load %arg0[%c1] : memref<4xi32, #tpu.memory_space<smem>>
    %c1_44 = arith.constant 1 : index
    %31 = memref.load %arg1[%c1_44] : memref<4xi32, #tpu.memory_space<smem>>
    %32 = arith.index_cast %30 : i32 to index
    %c0_45 = arith.constant 0 : index
    %c0_46 = arith.constant 0 : index
    %33 = vector.load %arg2[%32, %c0_45, %c0_46] : memref<8x1x32xf32, #tpu.memory_space<vmem>>, vector<1x1x32xf32>
    %34 = vector.shape_cast %33 : vector<1x1x32xf32> to vector<1x32xf32>
    %c1_47 = arith.constant 1 : index
    %c0_48 = arith.constant 0 : index
    %35 = vector.load %arg12[%c1_47, %c0_48] : memref<4x32xf32, #tpu.memory_space<vmem>>, vector<1x32xf32>
    tpu.vector_store %arg12[%c1_47, %c0_48], %34 {strides = array<i32>} : memref<4x32xf32, #tpu.memory_space<vmem>>, vector<1x32xf32>,
    %36 = arith.index_cast %30 : i32 to index
    %c0_49 = arith.constant 0 : index
    %c0_50 = arith.constant 0 : index
    %37 = vector.load %arg3[%36, %c0_49, %c0_50] : memref<8x1x16xf32, #tpu.memory_space<vmem>>, vector<1x1x16xf32>
    %38 = vector.shape_cast %37 : vector<1x1x16xf32> to vector<1x16xf32>
    %c1_51 = arith.constant 1 : index
    %c0_52 = arith.constant 0 : index
    %39 = vector.load %arg13[%c1_51, %c0_52] : memref<4x32xf32, #tpu.memory_space<vmem>>, vector<1x16xf32>
    tpu.vector_store %arg13[%c1_51, %c0_52], %38 {strides = array<i32>} : memref<4x32xf32, #tpu.memory_space<vmem>>, vector<1x16xf32>,
    %40 = arith.index_cast %30 : i32 to index
    %c0_53 = arith.constant 0 : index
    %c0_54 = arith.constant 0 : index
    %41 = vector.load %arg4[%40, %c0_53, %c0_54] : memref<8x1x16xf32, #tpu.memory_space<vmem>>, vector<1x1x16xf32>
    %42 = vector.shape_cast %41 : vector<1x1x16xf32> to vector<1x16xf32>
    %c1_55 = arith.constant 1 : index
    %c16_56 = arith.constant 16 : index
    %43 = vector.load %arg13[%c1_55, %c16_56] : memref<4x32xf32, #tpu.memory_space<vmem>>, vector<1x16xf32>
    tpu.vector_store %arg13[%c1_55, %c16_56], %42 {strides = array<i32>} : memref<4x32xf32, #tpu.memory_space<vmem>>, vector<1x16xf32>,
    %44 = arith.index_cast %31 : i32 to index
    %c0_57 = arith.constant 0 : index
    %c0_58 = arith.constant 0 : index
    %45 = vector.load %arg3[%44, %c0_57, %c0_58] : memref<8x1x16xf32, #tpu.memory_space<vmem>>, vector<1x1x16xf32>
    %46 = vector.shape_cast %45 : vector<1x1x16xf32> to vector<1x16xf32>
    %c1_59 = arith.constant 1 : index
    %c0_60 = arith.constant 0 : index
    %47 = vector.load %arg14[%c1_59, %c0_60] : memref<4x32xf32, #tpu.memory_space<vmem>>, vector<1x16xf32>
    tpu.vector_store %arg14[%c1_59, %c0_60], %46 {strides = array<i32>} : memref<4x32xf32, #tpu.memory_space<vmem>>, vector<1x16xf32>,
    %48 = arith.index_cast %31 : i32 to index
    %c0_61 = arith.constant 0 : index
    %c0_62 = arith.constant 0 : index
    %49 = vector.load %arg4[%48, %c0_61, %c0_62] : memref<8x1x16xf32, #tpu.memory_space<vmem>>, vector<1x1x16xf32>
    %50 = vector.shape_cast %49 : vector<1x1x16xf32> to vector<1x16xf32>
    %c1_63 = arith.constant 1 : index
    %c16_64 = arith.constant 16 : index
    %51 = vector.load %arg14[%c1_63, %c16_64] : memref<4x32xf32, #tpu.memory_space<vmem>>, vector<1x16xf32>
    tpu.vector_store %arg14[%c1_63, %c16_64], %50 {strides = array<i32>} : memref<4x32xf32, #tpu.memory_space<vmem>>, vector<1x16xf32>,
    %c2 = arith.constant 2 : index
    %52 = memref.load %arg0[%c2] : memref<4xi32, #tpu.memory_space<smem>>
    %c2_65 = arith.constant 2 : index
    %53 = memref.load %arg1[%c2_65] : memref<4xi32, #tpu.memory_space<smem>>
    %54 = arith.index_cast %52 : i32 to index
    %c0_66 = arith.constant 0 : index
    %c0_67 = arith.constant 0 : index
    %55 = vector.load %arg2[%54, %c0_66, %c0_67] : memref<8x1x32xf32, #tpu.memory_space<vmem>>, vector<1x1x32xf32>
    %56 = vector.shape_cast %55 : vector<1x1x32xf32> to vector<1x32xf32>
    %c2_68 = arith.constant 2 : index
    %c0_69 = arith.constant 0 : index
    %57 = vector.load %arg12[%c2_68, %c0_69] : memref<4x32xf32, #tpu.memory_space<vmem>>, vector<1x32xf32>
    tpu.vector_store %arg12[%c2_68, %c0_69], %56 {strides = array<i32>} : memref<4x32xf32, #tpu.memory_space<vmem>>, vector<1x32xf32>,
    %58 = arith.index_cast %52 : i32 to index
    %c0_70 = arith.constant 0 : index
    %c0_71 = arith.constant 0 : index
    %59 = vector.load %arg3[%58, %c0_70, %c0_71] : memref<8x1x16xf32, #tpu.memory_space<vmem>>, vector<1x1x16xf32>
    %60 = vector.shape_cast %59 : vector<1x1x16xf32> to vector<1x16xf32>
    %c2_72 = arith.constant 2 : index
    %c0_73 = arith.constant 0 : index
    %61 = vector.load %arg13[%c2_72, %c0_73] : memref<4x32xf32, #tpu.memory_space<vmem>>, vector<1x16xf32>
    tpu.vector_store %arg13[%c2_72, %c0_73], %60 {strides = array<i32>} : memref<4x32xf32, #tpu.memory_space<vmem>>, vector<1x16xf32>,
    %62 = arith.index_cast %52 : i32 to index
    %c0_74 = arith.constant 0 : index
    %c0_75 = arith.constant 0 : index
    %63 = vector.load %arg4[%62, %c0_74, %c0_75] : memref<8x1x16xf32, #tpu.memory_space<vmem>>, vector<1x1x16xf32>
    %64 = vector.shape_cast %63 : vector<1x1x16xf32> to vector<1x16xf32>
    %c2_76 = arith.constant 2 : index
    %c16_77 = arith.constant 16 : index
    %65 = vector.load %arg13[%c2_76, %c16_77] : memref<4x32xf32, #tpu.memory_space<vmem>>, vector<1x16xf32>
    tpu.vector_store %arg13[%c2_76, %c16_77], %64 {strides = array<i32>} : memref<4x32xf32, #tpu.memory_space<vmem>>, vector<1x16xf32>,
    %66 = arith.index_cast %53 : i32 to index
    %c0_78 = arith.constant 0 : index
    %c0_79 = arith.constant 0 : index
    %67 = vector.load %arg3[%66, %c0_78, %c0_79] : memref<8x1x16xf32, #tpu.memory_space<vmem>>, vector<1x1x16xf32>
    %68 = vector.shape_cast %67 : vector<1x1x16xf32> to vector<1x16xf32>
    %c2_80 = arith.constant 2 : index
    %c0_81 = arith.constant 0 : index
    %69 = vector.load %arg14[%c2_80, %c0_81] : memref<4x32xf32, #tpu.memory_space<vmem>>, vector<1x16xf32>
    tpu.vector_store %arg14[%c2_80, %c0_81], %68 {strides = array<i32>} : memref<4x32xf32, #tpu.memory_space<vmem>>, vector<1x16xf32>,
    %70 = arith.index_cast %53 : i32 to index
    %c0_82 = arith.constant 0 : index
    %c0_83 = arith.constant 0 : index
    %71 = vector.load %arg4[%70, %c0_82, %c0_83] : memref<8x1x16xf32, #tpu.memory_space<vmem>>, vector<1x1x16xf32>
    %72 = vector.shape_cast %71 : vector<1x1x16xf32> to vector<1x16xf32>
    %c2_84 = arith.constant 2 : index
    %c16_85 = arith.constant 16 : index
    %73 = vector.load %arg14[%c2_84, %c16_85] : memref<4x32xf32, #tpu.memory_space<vmem>>, vector<1x16xf32>
    tpu.vector_store %arg14[%c2_84, %c16_85], %72 {strides = array<i32>} : memref<4x32xf32, #tpu.memory_space<vmem>>, vector<1x16xf32>,
    %c3 = arith.constant 3 : index
    %74 = memref.load %arg0[%c3] : memref<4xi32, #tpu.memory_space<smem>>
    %c3_86 = arith.constant 3 : index
    %75 = memref.load %arg1[%c3_86] : memref<4xi32, #tpu.memory_space<smem>>
    %76 = arith.index_cast %74 : i32 to index
    %c0_87 = arith.constant 0 : index
    %c0_88 = arith.constant 0 : index
    %77 = vector.load %arg2[%76, %c0_87, %c0_88] : memref<8x1x32xf32, #tpu.memory_space<vmem>>, vector<1x1x32xf32>
    %78 = vector.shape_cast %77 : vector<1x1x32xf32> to vector<1x32xf32>
    %c3_89 = arith.constant 3 : index
    %c0_90 = arith.constant 0 : index
    %79 = vector.load %arg12[%c3_89, %c0_90] : memref<4x32xf32, #tpu.memory_space<vmem>>, vector<1x32xf32>
    tpu.vector_store %arg12[%c3_89, %c0_90], %78 {strides = array<i32>} : memref<4x32xf32, #tpu.memory_space<vmem>>, vector<1x32xf32>,
    %80 = arith.index_cast %74 : i32 to index
    %c0_91 = arith.constant 0 : index
    %c0_92 = arith.constant 0 : index
    %81 = vector.load %arg3[%80, %c0_91, %c0_92] : memref<8x1x16xf32, #tpu.memory_space<vmem>>, vector<1x1x16xf32>
    %82 = vector.shape_cast %81 : vector<1x1x16xf32> to vector<1x16xf32>
    %c3_93 = arith.constant 3 : index
    %c0_94 = arith.constant 0 : index
    %83 = vector.load %arg13[%c3_93, %c0_94] : memref<4x32xf32, #tpu.memory_space<vmem>>, vector<1x16xf32>
    tpu.vector_store %arg13[%c3_93, %c0_94], %82 {strides = array<i32>} : memref<4x32xf32, #tpu.memory_space<vmem>>, vector<1x16xf32>,
    %84 = arith.index_cast %74 : i32 to index
    %c0_95 = arith.constant 0 : index
    %c0_96 = arith.constant 0 : index
    %85 = vector.load %arg4[%84, %c0_95, %c0_96] : memref<8x1x16xf32, #tpu.memory_space<vmem>>, vector<1x1x16xf32>
    %86 = vector.shape_cast %85 : vector<1x1x16xf32> to vector<1x16xf32>
    %c3_97 = arith.constant 3 : index
    %c16_98 = arith.constant 16 : index
    %87 = vector.load %arg13[%c3_97, %c16_98] : memref<4x32xf32, #tpu.memory_space<vmem>>, vector<1x16xf32>
    tpu.vector_store %arg13[%c3_97, %c16_98], %86 {strides = array<i32>} : memref<4x32xf32, #tpu.memory_space<vmem>>, vector<1x16xf32>,
    %88 = arith.index_cast %75 : i32 to index
    %c0_99 = arith.constant 0 : index
    %c0_100 = arith.constant 0 : index
    %89 = vector.load %arg3[%88, %c0_99, %c0_100] : memref<8x1x16xf32, #tpu.memory_space<vmem>>, vector<1x1x16xf32>
    %90 = vector.shape_cast %89 : vector<1x1x16xf32> to vector<1x16xf32>
    %c3_101 = arith.constant 3 : index
    %c0_102 = arith.constant 0 : index
    %91 = vector.load %arg14[%c3_101, %c0_102] : memref<4x32xf32, #tpu.memory_space<vmem>>, vector<1x16xf32>
    tpu.vector_store %arg14[%c3_101, %c0_102], %90 {strides = array<i32>} : memref<4x32xf32, #tpu.memory_space<vmem>>, vector<1x16xf32>,
    %92 = arith.index_cast %75 : i32 to index
    %c0_103 = arith.constant 0 : index
    %c0_104 = arith.constant 0 : index
    %93 = vector.load %arg4[%92, %c0_103, %c0_104] : memref<8x1x16xf32, #tpu.memory_space<vmem>>, vector<1x1x16xf32>
    %94 = vector.shape_cast %93 : vector<1x1x16xf32> to vector<1x16xf32>
    %c3_105 = arith.constant 3 : index
    %c16_106 = arith.constant 16 : index
    %95 = vector.load %arg14[%c3_105, %c16_106] : memref<4x32xf32, #tpu.memory_space<vmem>>, vector<1x16xf32>
    tpu.vector_store %arg14[%c3_105, %c16_106], %94 {strides = array<i32>} : memref<4x32xf32, #tpu.memory_space<vmem>>, vector<1x16xf32>,
    %c0_107 = arith.constant 0 : index
    %c0_108 = arith.constant 0 : index
    %96 = vector.load %arg12[%c0_107, %c0_108] : memref<4x32xf32, #tpu.memory_space<vmem>>, vector<4x32xf32>
    %c0_109 = arith.constant 0 : index
    %c0_110 = arith.constant 0 : index
    %97 = vector.load %arg7[%c0_109, %c0_110] : memref<35x16xf32, #tpu.memory_space<vmem>>, vector<32x16xf32>
    %c32 = arith.constant 32 : index
    %c0_111 = arith.constant 0 : index
    %98 = vector.load %arg7[%c32, %c0_111] : memref<35x16xf32, #tpu.memory_space<vmem>>, vector<1x16xf32>
    %c33 = arith.constant 33 : index
    %c0_112 = arith.constant 0 : index
    %99 = vector.load %arg7[%c33, %c0_112] : memref<35x16xf32, #tpu.memory_space<vmem>>, vector<1x16xf32>
    %c34 = arith.constant 34 : index
    %c0_113 = arith.constant 0 : index
    %100 = vector.load %arg7[%c34, %c0_113] : memref<35x16xf32, #tpu.memory_space<vmem>>, vector<1x1xf32>
    %cst = arith.constant dense<0.000000e+00> : vector<4x16xf32>
    %101 = tpu.matmul %96, %97, %cst {dimension_numbers = #tpu.dot_dimension_numbers<[1], [0], [0], [1], [0, 0, 1, 1], [], []>} : vector<4x32xf32>, vector<32x16xf32>, vector<4x16xf32> -> vector<4x16xf32>
    %102 = vector.broadcast %98 : vector<1x16xf32> to vector<4x16xf32>
    %103 = arith.addf %101, %102 : vector<4x16xf32>
    %cst_114 = arith.constant 0.000000e+00 : f32
    %104 = vector.broadcast %cst_114 : f32 to vector<4x16xf32>
    %105 = arith.maximumf %103, %104 : vector<4x16xf32>
    %106 = vector.broadcast %99 : vector<1x16xf32> to vector<4x16xf32>
    %107 = arith.mulf %105, %106 : vector<4x16xf32>
    %cst_115 = arith.constant dense<0.000000e+00> : vector<4xf32>
    %108 = vector.multi_reduction <add>, %107, %cst_115 [1] : vector<4x16xf32> to vector<4xf32>
    %109 = vector.shape_cast %108 : vector<4xf32> to vector<4x1xf32>
    %110 = vector.broadcast %100 : vector<1x1xf32> to vector<4x1xf32>
    %111 = arith.addf %109, %110 : vector<4x1xf32>
    %112 = arith.negf %111 : vector<4x1xf32>
    %113 = math.exp %112 : vector<4x1xf32>
    %cst_116 = arith.constant 1.000000e+00 : f32
    %114 = vector.broadcast %cst_116 : f32 to vector<4x1xf32>
    %115 = arith.addf %114, %113 : vector<4x1xf32>
    %116 = arith.divf %114, %115 : vector<4x1xf32>
    %c0_117 = arith.constant 0 : index
    %c0_118 = arith.constant 0 : index
    %117 = vector.load %arg14[%c0_117, %c0_118] : memref<4x32xf32, #tpu.memory_space<vmem>>, vector<4x32xf32>
    %c0_119 = arith.constant 0 : index
    %c0_120 = arith.constant 0 : index
    %118 = vector.load %arg13[%c0_119, %c0_120] : memref<4x32xf32, #tpu.memory_space<vmem>>, vector<4x32xf32>
    %119 = arith.subf %118, %117 : vector<4x32xf32>
    %120 = vector.broadcast %116 : vector<4x1xf32> to vector<4x32xf32>
    %121 = arith.mulf %120, %119 : vector<4x32xf32>
    %122 = arith.addf %117, %121 : vector<4x32xf32>
    %cst_121 = arith.constant dense<0xFF800000> : vector<4xf32>
    %123 = vector.multi_reduction <maximumf>, %122, %cst_121 [1] : vector<4x32xf32> to vector<4xf32>
    %124 = vector.shape_cast %123 : vector<4xf32> to vector<4x1xf32>
    %125 = vector.broadcast %124 : vector<4x1xf32> to vector<4x32xf32>
    %126 = arith.subf %122, %125 : vector<4x32xf32>
    %127 = math.exp %126 : vector<4x32xf32>
    %cst_122 = arith.constant dense<0.000000e+00> : vector<4xf32>
    %128 = vector.multi_reduction <add>, %127, %cst_122 [1] : vector<4x32xf32> to vector<4xf32>
    %129 = vector.shape_cast %128 : vector<4xf32> to vector<4x1xf32>
    %130 = tpu.reciprocal %129 {approx = true} : vector<4x1xf32> -> vector<4x1xf32>
    %131 = vector.broadcast %130 : vector<4x1xf32> to vector<4x32xf32>
    %132 = arith.mulf %127, %131 : vector<4x32xf32>
    %c0_123 = arith.constant 0 : index
    %c0_124 = arith.constant 0 : index
    %133 = vector.load %arg6[%c0_123, %c0_124] : memref<32x32xf32, #tpu.memory_space<vmem>>, vector<32x32xf32>
    %cst_125 = arith.constant dense<0.000000e+00> : vector<4x32xf32>
    %134 = tpu.matmul %132, %133, %cst_125 {dimension_numbers = #tpu.dot_dimension_numbers<[1], [0], [0], [1], [0, 0, 1, 1], [], []>} : vector<4x32xf32>, vector<32x32xf32>, vector<4x32xf32> -> vector<4x32xf32>
    %c0_126 = arith.constant 0 : index
    %135 = memref.load %arg0[%c0_126] : memref<4xi32, #tpu.memory_space<smem>>
    %136 = vector.extract_strided_slice %122 {offsets = [0, 0], sizes = [1, 16], strides = [1, 1]} : vector<4x32xf32> to vector<1x16xf32>
    %137 = arith.index_cast %135 : i32 to index
    %c0_127 = arith.constant 0 : index
    %c0_128 = arith.constant 0 : index
    %138 = vector.load %arg9[%137, %c0_127, %c0_128] : memref<8x1x16xf32, #tpu.memory_space<vmem>>, vector<1x1x16xf32>
    %139 = vector.shape_cast %138 : vector<1x1x16xf32> to vector<1x16xf32>
    %140 = vector.shape_cast %136 : vector<1x16xf32> to vector<1x1x16xf32>
    tpu.vector_store %arg9[%137, %c0_127, %c0_128], %140 {strides = array<i32>} : memref<8x1x16xf32, #tpu.memory_space<vmem>>, vector<1x1x16xf32>,
    %141 = vector.extract_strided_slice %122 {offsets = [0, 16], sizes = [1, 16], strides = [1, 1]} : vector<4x32xf32> to vector<1x16xf32>
    %142 = arith.index_cast %135 : i32 to index
    %c0_129 = arith.constant 0 : index
    %c0_130 = arith.constant 0 : index
    %143 = vector.load %arg10[%142, %c0_129, %c0_130] : memref<8x1x16xf32, #tpu.memory_space<vmem>>, vector<1x1x16xf32>
    %144 = vector.shape_cast %143 : vector<1x1x16xf32> to vector<1x16xf32>
    %145 = vector.shape_cast %141 : vector<1x16xf32> to vector<1x1x16xf32>
    tpu.vector_store %arg10[%142, %c0_129, %c0_130], %145 {strides = array<i32>} : memref<8x1x16xf32, #tpu.memory_space<vmem>>, vector<1x1x16xf32>,
    %146 = vector.extract_strided_slice %132 {offsets = [0, 0], sizes = [1, 32], strides = [1, 1]} : vector<4x32xf32> to vector<1x32xf32>
    %147 = arith.index_cast %135 : i32 to index
    %c0_131 = arith.constant 0 : index
    %c0_132 = arith.constant 0 : index
    %148 = vector.load %arg11[%147, %c0_131, %c0_132] : memref<8x1x32xf32, #tpu.memory_space<vmem>>, vector<1x1x32xf32>
    %149 = vector.shape_cast %148 : vector<1x1x32xf32> to vector<1x32xf32>
    %150 = vector.shape_cast %146 : vector<1x32xf32> to vector<1x1x32xf32>
    tpu.vector_store %arg11[%147, %c0_131, %c0_132], %150 {strides = array<i32>} : memref<8x1x32xf32, #tpu.memory_space<vmem>>, vector<1x1x32xf32>,
    %151 = vector.extract_strided_slice %134 {offsets = [0, 0], sizes = [1, 32], strides = [1, 1]} : vector<4x32xf32> to vector<1x32xf32>
    %152 = arith.index_cast %135 : i32 to index
    %c0_133 = arith.constant 0 : index
    %c0_134 = arith.constant 0 : index
    %153 = vector.load %arg8[%152, %c0_133, %c0_134] : memref<8x1x32xf32, #tpu.memory_space<vmem>>, vector<1x1x32xf32>
    %154 = vector.shape_cast %153 : vector<1x1x32xf32> to vector<1x32xf32>
    %155 = vector.shape_cast %151 : vector<1x32xf32> to vector<1x1x32xf32>
    tpu.vector_store %arg8[%152, %c0_133, %c0_134], %155 {strides = array<i32>} : memref<8x1x32xf32, #tpu.memory_space<vmem>>, vector<1x1x32xf32>,
    %c1_135 = arith.constant 1 : index
    %156 = memref.load %arg0[%c1_135] : memref<4xi32, #tpu.memory_space<smem>>
    %157 = vector.extract_strided_slice %122 {offsets = [1, 0], sizes = [1, 16], strides = [1, 1]} : vector<4x32xf32> to vector<1x16xf32>
    %158 = arith.index_cast %156 : i32 to index
    %c0_136 = arith.constant 0 : index
    %c0_137 = arith.constant 0 : index
    %159 = vector.load %arg9[%158, %c0_136, %c0_137] : memref<8x1x16xf32, #tpu.memory_space<vmem>>, vector<1x1x16xf32>
    %160 = vector.shape_cast %159 : vector<1x1x16xf32> to vector<1x16xf32>
    %161 = vector.shape_cast %157 : vector<1x16xf32> to vector<1x1x16xf32>
    tpu.vector_store %arg9[%158, %c0_136, %c0_137], %161 {strides = array<i32>} : memref<8x1x16xf32, #tpu.memory_space<vmem>>, vector<1x1x16xf32>,
    %162 = vector.extract_strided_slice %122 {offsets = [1, 16], sizes = [1, 16], strides = [1, 1]} : vector<4x32xf32> to vector<1x16xf32>
    %163 = arith.index_cast %156 : i32 to index
    %c0_138 = arith.constant 0 : index
    %c0_139 = arith.constant 0 : index
    %164 = vector.load %arg10[%163, %c0_138, %c0_139] : memref<8x1x16xf32, #tpu.memory_space<vmem>>, vector<1x1x16xf32>
    %165 = vector.shape_cast %164 : vector<1x1x16xf32> to vector<1x16xf32>
    %166 = vector.shape_cast %162 : vector<1x16xf32> to vector<1x1x16xf32>
    tpu.vector_store %arg10[%163, %c0_138, %c0_139], %166 {strides = array<i32>} : memref<8x1x16xf32, #tpu.memory_space<vmem>>, vector<1x1x16xf32>,
    %167 = vector.extract_strided_slice %132 {offsets = [1, 0], sizes = [1, 32], strides = [1, 1]} : vector<4x32xf32> to vector<1x32xf32>
    %168 = arith.index_cast %156 : i32 to index
    %c0_140 = arith.constant 0 : index
    %c0_141 = arith.constant 0 : index
    %169 = vector.load %arg11[%168, %c0_140, %c0_141] : memref<8x1x32xf32, #tpu.memory_space<vmem>>, vector<1x1x32xf32>
    %170 = vector.shape_cast %169 : vector<1x1x32xf32> to vector<1x32xf32>
    %171 = vector.shape_cast %167 : vector<1x32xf32> to vector<1x1x32xf32>
    tpu.vector_store %arg11[%168, %c0_140, %c0_141], %171 {strides = array<i32>} : memref<8x1x32xf32, #tpu.memory_space<vmem>>, vector<1x1x32xf32>,
    %172 = vector.extract_strided_slice %134 {offsets = [1, 0], sizes = [1, 32], strides = [1, 1]} : vector<4x32xf32> to vector<1x32xf32>
    %173 = arith.index_cast %156 : i32 to index
    %c0_142 = arith.constant 0 : index
    %c0_143 = arith.constant 0 : index
    %174 = vector.load %arg8[%173, %c0_142, %c0_143] : memref<8x1x32xf32, #tpu.memory_space<vmem>>, vector<1x1x32xf32>
    %175 = vector.shape_cast %174 : vector<1x1x32xf32> to vector<1x32xf32>
    %176 = vector.shape_cast %172 : vector<1x32xf32> to vector<1x1x32xf32>
    tpu.vector_store %arg8[%173, %c0_142, %c0_143], %176 {strides = array<i32>} : memref<8x1x32xf32, #tpu.memory_space<vmem>>, vector<1x1x32xf32>,
    %c2_144 = arith.constant 2 : index
    %177 = memref.load %arg0[%c2_144] : memref<4xi32, #tpu.memory_space<smem>>
    %178 = vector.extract_strided_slice %122 {offsets = [2, 0], sizes = [1, 16], strides = [1, 1]} : vector<4x32xf32> to vector<1x16xf32>
    %179 = arith.index_cast %177 : i32 to index
    %c0_145 = arith.constant 0 : index
    %c0_146 = arith.constant 0 : index
    %180 = vector.load %arg9[%179, %c0_145, %c0_146] : memref<8x1x16xf32, #tpu.memory_space<vmem>>, vector<1x1x16xf32>
    %181 = vector.shape_cast %180 : vector<1x1x16xf32> to vector<1x16xf32>
    %182 = vector.shape_cast %178 : vector<1x16xf32> to vector<1x1x16xf32>
    tpu.vector_store %arg9[%179, %c0_145, %c0_146], %182 {strides = array<i32>} : memref<8x1x16xf32, #tpu.memory_space<vmem>>, vector<1x1x16xf32>,
    %183 = vector.extract_strided_slice %122 {offsets = [2, 16], sizes = [1, 16], strides = [1, 1]} : vector<4x32xf32> to vector<1x16xf32>
    %184 = arith.index_cast %177 : i32 to index
    %c0_147 = arith.constant 0 : index
    %c0_148 = arith.constant 0 : index
    %185 = vector.load %arg10[%184, %c0_147, %c0_148] : memref<8x1x16xf32, #tpu.memory_space<vmem>>, vector<1x1x16xf32>
    %186 = vector.shape_cast %185 : vector<1x1x16xf32> to vector<1x16xf32>
    %187 = vector.shape_cast %183 : vector<1x16xf32> to vector<1x1x16xf32>
    tpu.vector_store %arg10[%184, %c0_147, %c0_148], %187 {strides = array<i32>} : memref<8x1x16xf32, #tpu.memory_space<vmem>>, vector<1x1x16xf32>,
    %188 = vector.extract_strided_slice %132 {offsets = [2, 0], sizes = [1, 32], strides = [1, 1]} : vector<4x32xf32> to vector<1x32xf32>
    %189 = arith.index_cast %177 : i32 to index
    %c0_149 = arith.constant 0 : index
    %c0_150 = arith.constant 0 : index
    %190 = vector.load %arg11[%189, %c0_149, %c0_150] : memref<8x1x32xf32, #tpu.memory_space<vmem>>, vector<1x1x32xf32>
    %191 = vector.shape_cast %190 : vector<1x1x32xf32> to vector<1x32xf32>
    %192 = vector.shape_cast %188 : vector<1x32xf32> to vector<1x1x32xf32>
    tpu.vector_store %arg11[%189, %c0_149, %c0_150], %192 {strides = array<i32>} : memref<8x1x32xf32, #tpu.memory_space<vmem>>, vector<1x1x32xf32>,
    %193 = vector.extract_strided_slice %134 {offsets = [2, 0], sizes = [1, 32], strides = [1, 1]} : vector<4x32xf32> to vector<1x32xf32>
    %194 = arith.index_cast %177 : i32 to index
    %c0_151 = arith.constant 0 : index
    %c0_152 = arith.constant 0 : index
    %195 = vector.load %arg8[%194, %c0_151, %c0_152] : memref<8x1x32xf32, #tpu.memory_space<vmem>>, vector<1x1x32xf32>
    %196 = vector.shape_cast %195 : vector<1x1x32xf32> to vector<1x32xf32>
    %197 = vector.shape_cast %193 : vector<1x32xf32> to vector<1x1x32xf32>
    tpu.vector_store %arg8[%194, %c0_151, %c0_152], %197 {strides = array<i32>} : memref<8x1x32xf32, #tpu.memory_space<vmem>>, vector<1x1x32xf32>,
    %c3_153 = arith.constant 3 : index
    %198 = memref.load %arg0[%c3_153] : memref<4xi32, #tpu.memory_space<smem>>
    %199 = vector.extract_strided_slice %122 {offsets = [3, 0], sizes = [1, 16], strides = [1, 1]} : vector<4x32xf32> to vector<1x16xf32>
    %200 = arith.index_cast %198 : i32 to index
    %c0_154 = arith.constant 0 : index
    %c0_155 = arith.constant 0 : index
    %201 = vector.load %arg9[%200, %c0_154, %c0_155] : memref<8x1x16xf32, #tpu.memory_space<vmem>>, vector<1x1x16xf32>
    %202 = vector.shape_cast %201 : vector<1x1x16xf32> to vector<1x16xf32>
    %203 = vector.shape_cast %199 : vector<1x16xf32> to vector<1x1x16xf32>
    tpu.vector_store %arg9[%200, %c0_154, %c0_155], %203 {strides = array<i32>} : memref<8x1x16xf32, #tpu.memory_space<vmem>>, vector<1x1x16xf32>,
    %204 = vector.extract_strided_slice %122 {offsets = [3, 16], sizes = [1, 16], strides = [1, 1]} : vector<4x32xf32> to vector<1x16xf32>
    %205 = arith.index_cast %198 : i32 to index
    %c0_156 = arith.constant 0 : index
    %c0_157 = arith.constant 0 : index
    %206 = vector.load %arg10[%205, %c0_156, %c0_157] : memref<8x1x16xf32, #tpu.memory_space<vmem>>, vector<1x1x16xf32>
    %207 = vector.shape_cast %206 : vector<1x1x16xf32> to vector<1x16xf32>
    %208 = vector.shape_cast %204 : vector<1x16xf32> to vector<1x1x16xf32>
    tpu.vector_store %arg10[%205, %c0_156, %c0_157], %208 {strides = array<i32>} : memref<8x1x16xf32, #tpu.memory_space<vmem>>, vector<1x1x16xf32>,
    %209 = vector.extract_strided_slice %132 {offsets = [3, 0], sizes = [1, 32], strides = [1, 1]} : vector<4x32xf32> to vector<1x32xf32>
    %210 = arith.index_cast %198 : i32 to index
    %c0_158 = arith.constant 0 : index
    %c0_159 = arith.constant 0 : index
    %211 = vector.load %arg11[%210, %c0_158, %c0_159] : memref<8x1x32xf32, #tpu.memory_space<vmem>>, vector<1x1x32xf32>
    %212 = vector.shape_cast %211 : vector<1x1x32xf32> to vector<1x32xf32>
    %213 = vector.shape_cast %209 : vector<1x32xf32> to vector<1x1x32xf32>
    tpu.vector_store %arg11[%210, %c0_158, %c0_159], %213 {strides = array<i32>} : memref<8x1x32xf32, #tpu.memory_space<vmem>>, vector<1x1x32xf32>,
    %214 = vector.extract_strided_slice %134 {offsets = [3, 0], sizes = [1, 32], strides = [1, 1]} : vector<4x32xf32> to vector<1x32xf32>
    %215 = arith.index_cast %198 : i32 to index
    %c0_160 = arith.constant 0 : index
    %c0_161 = arith.constant 0 : index
    %216 = vector.load %arg8[%215, %c0_160, %c0_161] : memref<8x1x32xf32, #tpu.memory_space<vmem>>, vector<1x1x32xf32>
    %217 = vector.shape_cast %216 : vector<1x1x32xf32> to vector<1x32xf32>
    %218 = vector.shape_cast %214 : vector<1x32xf32> to vector<1x1x32xf32>
    tpu.vector_store %arg8[%215, %c0_160, %c0_161], %218 {strides = array<i32>} : memref<8x1x32xf32, #tpu.memory_space<vmem>>, vector<1x1x32xf32>,
    return
  }
}

</mosaic_0001>

<bundles_post_ra>
// kernel: node_trans.1
= control target key start
LH: loop header
LB: loop body
LE: loop exit
PB: predicated region body
PF: predicated region fallthrough
CT: control target
= control target key end

     0   :  { %17 = vsyncpa [#allocation6], 0  ;;  %s1216_s0 = inlined_call_operand.vmem [shape: s32[4], index: 0, kind: input, shape index: {}]   ;;  %s1217_s1 = inlined_call_operand.vmem [shape: s32[4], index: 1, kind: input, shape index: {}]   ;;  %s1218_s2 = inlined_call_operand.vmem [shape: f32[8,1,32], index: 2, kind: input, shape index: {}, may-alias: {2,8}]   ;;  %s1219_s3 = inlined_call_operand.vmem [shape: f32[8,1,16], index: 3, kind: input, shape index: {}, may-alias: {3,9}]   ;;  %s1220_s4 = inlined_call_operand.vmem [shape: f32[8,1,16], index: 4, kind: input, shape index: {}, may-alias: {4,10}]   ;;  %s1221_s5 = inlined_call_operand.vmem [shape: f32[8,1,32], index: 5, kind: input, shape index: {}, may-alias: {5,11}]   ;;  %s1222_s6 = inlined_call_operand.vmem [shape: f32[32,32], index: 6, kind: input, shape index: {}]   ;;  %s1223_s7 = inlined_call_operand.vmem [shape: f32[35,16], index: 7, kind: input, shape index: {}]   ;;  %s1224_s8 = inlined_call_operand.vmem [shape: f32[8,1,32], index: 8, kind: output, shape index: {0}, may-alias: {2,8}]   ;;  %s1225_s9 = inlined_call_operand.vmem [shape: f32[8,1,16], index: 9, kind: output, shape index: {1}, may-alias: {3,9}]   ;;  %s1226_s10 = inlined_call_operand.vmem [shape: f32[8,1,16], index: 10, kind: output, shape index: {2}, may-alias: {4,10}]   ;;  %s1227_s11 = inlined_call_operand.vmem [shape: f32[8,1,32], index: 11, kind: output, shape index: {3}, may-alias: {5,11}]  }
   0x1   :  { %s25_s19 = sshll.u32 %s1216_s0, 4  ;;  %s26_s19 = int_to_ptr.vmem [resolvable:$true] %s25_s19 }
   0x2   :  { %18 = vsyncpa [#allocation8], 0  ;;  %s35_s22 = sshll.u32 %s1217_s1, 4  ;;  %s647_s23 = scalar_lea.vmem %s26_s19, 16  ;;  %s36_s22 = int_to_ptr.vmem [resolvable:$true] %s35_s22 }
   0x3   :  { %p648_p0 = scmp.ne.s32.totalorder %s26_s19, %s647_s23  ;;  %p652_p1 = scmp.lt.s32.totalorder %s26_s19, %s26_s19 }
   0x4   :  { %p653_p2 = scmp.lt.s32.totalorder %s647_s23, %s647_s23 }
   0x6   :  { %p654_p3 = por %p653_p2, %p652_p1 }
   0x8   :  { %p655_p4 = pnand %p654_p3, %p648_p0 }
   0xa   :  { %658 = shalt.err (!%p655_p4)
}
   0xb   :  { %s675_s24 = smov [#allocation5]   ;;  %s659_s25 = scalar_lea.vmem %s36_s22, 16 }
   0xc   :  { %28 = dma.vmem_to_smem %s26_s19, 16, %s675_s24, [#allocation6]  }
   0xd   :  { %p660_p5 = scmp.ne.s32.totalorder %s36_s22, %s659_s25  ;;  %p664_p6 = scmp.lt.s32.totalorder %s36_s22, %s36_s22 }
   0xe   :  { %p665_p7 = scmp.lt.s32.totalorder %s659_s25, %s659_s25 }
  0x10   :  { %p666_p8 = por %p665_p7, %p664_p6 }
  0x12   :  { %p667_p9 = pnand %p666_p8, %p660_p5 }
  0x14   :  { %670 = shalt.err (!%p667_p9)
}
  0x15   :  { %s676_s0 = smov [#allocation7]  }
  0x16   :  { %38 = dma.vmem_to_smem %s36_s22, 16, %s676_s0, [#allocation8]  }
  0x17   :  { %671 = dma.done.wait [#allocation6], 16  }
  0x18   :  { %672 = vsyncadd [#allocation6], 4294967280 }
  0x19   :  { %673 = dma.done.wait [#allocation8], 16  }
  0x1a   :  { %674 = vsyncadd [#allocation8], 4294967280 }
  0x1b   :  { %57 = sfence }
  0x1c   :  { %v258_v0 = vld [vmem:[%s1223_s7] sm:$0xff]  ;;  %v259_v1 = vld [vmem:[%s1223_s7 + $0x8] sm:$0xff]  ;;  %v260_v2 = vld [vmem:[%s1223_s7 + $0x10] sm:$0xff]  ;;  %v677_v3 = vmov 0.0|0.0   ;;  %vm678_vm0 = vmmov 0   ;;  %v679_v6 = vmov 0.0  }
  0x1d   :  { %618 = vmatprep.subr.bf16.mxu0 %v677_v3  ;;  %v619_v4 = vpack.c.bf16 %v259_v1, %v258_v0  ;;  %v261_v5 = vld [vmem:[%s1223_s7 + $0x18] sm:$0xff]  ;;  %604 = vmatprep.mubr.msk.f32.mxu0 %vm678_vm0, %v679_v6  ;;  %v58_v7 = vld [vmem:[%s1218_s2] sm:$0x1]  ;;  %v59_v8 = vld [vmem:[%s1218_s2 + $0x1] sm:$0x1]  ;;  %vm66_vm1 = vcmask 253952  }
  0x1e   :  { %v60_v9 = vld [vmem:[%s1218_s2 + $0x2] sm:$0x1]  ;;  %v61_v10 = vld [vmem:[%s1218_s2 + $0x3] sm:$0x1]  ;;  %v62_v11 = vld [vmem:[%s1218_s2 + $0x4] sm:$0x1]  ;;  %624 = vmatprep.subr.bf16.mxu1 %v677_v3  ;;  %615 = vmatprep.mubr.msk.f32.mxu1 %vm678_vm0, %v679_v6  ;;  %v622_v12 = vpack.c.bf16 %v261_v5, %v260_v2 }
  0x1f   :  { %67 = vst.msk [vmem:[%s1224_s8] sm:$0x1] %vm66_vm1, %v58_v7  ;;  %68 = vst.msk [vmem:[%s1224_s8 + $0x1] sm:$0x1] %vm66_vm1, %v59_v8  ;;  %620 = vmatpush3.bf16.msra.mxu0 %v619_v4  ;;  %v108_v16 = vld [vmem:[%s1221_s5] sm:$0x1] }
  0x20   :  { %621 = vmatprep.subr.bf16.mxu0 %v677_v3  ;;  %v109_v17 = vld [vmem:[%s1221_s5 + $0x1] sm:$0x1]  ;;  %v110_v18 = vld [vmem:[%s1221_s5 + $0x2] sm:$0x1]  ;;  %v111_v19 = vld [vmem:[%s1221_s5 + $0x3] sm:$0x1] }
  0x21   :  { %v112_v20 = vld [vmem:[%s1221_s5 + $0x4] sm:$0x1]  ;;  %v113_v21 = vld [vmem:[%s1221_s5 + $0x5] sm:$0x1]  ;;  %s868_s30 = sld [smem:[#allocation5]]  ;;  %s878_s15 = sld [smem:[#allocation5 + $0x1]] }
  0x22   :  { %116 = vst.msk [vmem:[%s1227_s11] sm:$0x1] %vm66_vm1, %v108_v16  ;;  %117 = vst.msk [vmem:[%s1227_s11 + $0x1] sm:$0x1] %vm66_vm1, %v109_v17  ;;  %s880_s16 = sld [smem:[#allocation5 + $0x2]]  ;;  %s882_s17 = sld [smem:[#allocation5 + $0x3]] }
  0x23   :  { %118 = vst.msk [vmem:[%s1227_s11 + $0x2] sm:$0x1] %vm66_vm1, %v110_v18  ;;  %623 = vmatpush3.bf16.msra.mxu0 %v622_v12  ;;  %vm269_vm2 = vcmask 261120   ;;  %vm83_vm3 = vcmask 122880   ;;  %v92_v29 = vld [vmem:[%s1220_s4] sm:$0x1] }
  0x24   :  { %v93_v30 = vld [vmem:[%s1220_s4 + $0x1] sm:$0x1]  ;;  %v94_v31 = vld [vmem:[%s1220_s4 + $0x2] sm:$0x1]  ;;  %v95_v32 = vld [vmem:[%s1220_s4 + $0x3] sm:$0x1] }
  0x25   :  { %v96_v33 = vld [vmem:[%s1220_s4 + $0x4] sm:$0x1]  ;;  %s961_s24 = sld [smem:[#allocation7]]  ;;  %s963_s25 = sld [smem:[#allocation7 + $0x1]]  ;;  %v577_v42 = vld [vmem:[%s1223_s7 + $0x20] ss:$0 sm:$0xff] }
  0x26   :  { %v63_v13 = vld [vmem:[%s1218_s2 + $0x5] sm:$0x1]  ;;  %v64_v14 = vld [vmem:[%s1218_s2 + $0x6] sm:$0x1]  ;;  %v65_v15 = vld [vmem:[%s1218_s2 + $0x7] sm:$0x1] }
  0x27   :  { %69 = vst.msk [vmem:[%s1224_s8 + $0x2] sm:$0x1] %vm66_vm1, %v60_v9  ;;  %70 = vst.msk [vmem:[%s1224_s8 + $0x3] sm:$0x1] %vm66_vm1, %v61_v10  ;;  %s126_s20 = scalar_lea.vmem %s1218_s2, %s868_s30  ;;  %s160_s23 = scalar_lea.vmem %s1218_s2, %s878_s15  ;;  %v579_v46 = vld [vmem:[%s1223_s7 + $0x21] ss:$0 sm:$0xff] }
  0x28   :  { %71 = vst.msk [vmem:[%s1224_s8 + $0x4] sm:$0x1] %vm66_vm1, %v62_v11  ;;  %72 = vst.msk [vmem:[%s1224_s8 + $0x5] sm:$0x1] %vm66_vm1, %v63_v13  ;;  %s193_s0 = scalar_lea.vmem %s1218_s2, %s880_s16  ;;  %s226_s27 = scalar_lea.vmem %s1218_s2, %s882_s17  ;;  %vm349_vm4 = vcmask 125952   ;;  %v681_v53 = vmov 0  }
  0x29   :  { %73 = vst.msk [vmem:[%s1224_s8 + $0x6] sm:$0x1] %vm66_vm1, %v64_v14  ;;  %74 = vst.msk [vmem:[%s1224_s8 + $0x7] sm:$0x1] %vm66_vm1, %v65_v15  ;;  %s166_s29 = scalar_lea.vmem %s1220_s4, %s878_s15  ;;  %s978_s14 = sld [smem:[#allocation7 + $0x2]]  ;;  %638 = vset.pattern.permute.xlu0 %v681_v53  ;;  %vm142_vm5 = vcmask 254080  }
  0x2a   :  { %v114_v22 = vld [vmem:[%s1221_s5 + $0x6] sm:$0x1]  ;;  %v115_v23 = vld [vmem:[%s1221_s5 + $0x7] sm:$0x1]  ;;  %100 = vst.msk [vmem:[%s1226_s10] sm:$0x1] %vm83_vm3, %v92_v29  ;;  %s232_s2 = scalar_lea.vmem %s1220_s4, %s882_s17  ;;  %s132_s22 = scalar_lea.vmem %s1220_s4, %s868_s30 }
  0x2b   :  { %119 = vst.msk [vmem:[%s1227_s11 + $0x3] sm:$0x1] %vm66_vm1, %v111_v19  ;;  %120 = vst.msk [vmem:[%s1227_s11 + $0x4] sm:$0x1] %vm66_vm1, %v112_v20  ;;  %s147_s26 = scalar_lea.vmem %s1220_s4, %s961_s24  ;;  %s680_s5 = smov 16   ;;  %vm374_vm6 = vcmask 257024  }
  0x2c   :  { %121 = vst.msk [vmem:[%s1227_s11 + $0x5] sm:$0x1] %vm66_vm1, %v113_v21  ;;  %122 = vst.msk [vmem:[%s1227_s11 + $0x6] sm:$0x1] %vm66_vm1, %v114_v22  ;;  %s180_s13 = scalar_lea.vmem %s1220_s4, %s963_s25  ;;  %s998_s28 = sld [smem:[#allocation7 + $0x3]]  ;;  %vm478_vm7 = vcmask 123905  }
  0x2d   :  { %123 = vst.msk [vmem:[%s1227_s11 + $0x7] sm:$0x1] %vm66_vm1, %v115_v23  ;;  %v75_v55 = vld [vmem:[%s1219_s3] sm:$0x1]  ;;  %v76_v56 = vld [vmem:[%s1219_s3 + $0x1] sm:$0x1]  ;;  %s144_s1 = scalar_lea.vmem %s1219_s3, %s961_s24  ;;  %s196_s18 = scalar_lea.vmem %s1219_s3, %s880_s16 }
  0x2e   :  { %101 = vst.msk [vmem:[%s1226_s10 + $0x1] sm:$0x1] %vm83_vm3, %v93_v30  ;;  %v77_v57 = vld [vmem:[%s1219_s3 + $0x2] sm:$0x1]  ;;  %v78_v58 = vld [vmem:[%s1219_s3 + $0x3] sm:$0x1]  ;;  %s229_s24 = scalar_lea.vmem %s1219_s3, %s882_s17  ;;  %s129_s12 = scalar_lea.vmem %s1219_s3, %s868_s30 }
  0x2f   :  { %v79_v59 = vld [vmem:[%s1219_s3 + $0x4] sm:$0x1]  ;;  %s210_s21 = scalar_lea.vmem %s1219_s3, %s978_s14  ;;  %v580_v14 = vld [vmem:[%s1223_s7 + $0x22] ss:$0 sm:$0xff]  ;;  %vm489_vm8 = vcmask 124930   ;;  %vm500_vm9 = vcmask 125955  }
  0x30   :  { %v127_v24 = vld [vmem:[%s126_s20] sm:$0x1]  ;;  %s199_s20 = scalar_lea.vmem %s1220_s4, %s880_s16  ;;  %84 = vst.msk [vmem:[%s1225_s9] sm:$0x1] %vm83_vm3, %v75_v55  ;;  %85 = vst.msk [vmem:[%s1225_s9 + $0x1] sm:$0x1] %vm83_vm3, %v76_v56 }
  0x31   :  { %128 = vst.msk [vmem:[#allocation2] sm:$0x1] %vm66_vm1, %v127_v24  ;;  %v161_v25 = vld [vmem:[%s160_s23] sm:$0x1]  ;;  %s213_s23 = scalar_lea.vmem %s1220_s4, %s978_s14  ;;  %vm483_vm10 = vcmask 254977   ;;  %vm494_vm11 = vcmask 256002   ;;  %s474_s14 = scalar_lea.vmem %s1224_s8, %s868_s30 }
  0x32   :  { %v194_v26 = vld [vmem:[%s193_s0] sm:$0x1]  ;;  %162 = vst.msk [vmem:[#allocation2 + $0x1] sm:$0x1] %vm66_vm1, %v161_v25  ;;  %s246_s19 = scalar_lea.vmem %s1220_s4, %s998_s28  ;;  %s482_s0 = scalar_lea.vmem %s1227_s11, %s878_s15  ;;  %vm505_vm12 = vcmask 257027  }
  0x33   :  { %195 = vst.msk [vmem:[#allocation2 + $0x2] sm:$0x1] %vm66_vm1, %v194_v26  ;;  %v227_v27 = vld [vmem:[%s226_s27] sm:$0x1]  ;;  %s243_s27 = scalar_lea.vmem %s1219_s3, %s998_s28  ;;  %s502_s28 = scalar_lea.vmem %s1226_s10, %s882_s17 }
  0x34   :  { %228 = vst.msk [vmem:[#allocation2 + $0x3] sm:$0x1] %vm66_vm1, %v227_v27 }
  0x35   :  { %v97_v34 = vld [vmem:[%s1220_s4 + $0x5] sm:$0x1]  ;;  %v98_v35 = vld [vmem:[%s1220_s4 + $0x6] sm:$0x1]  ;;  %v99_v36 = vld [vmem:[%s1220_s4 + $0x7] sm:$0x1]  ;;  %s480_s4 = scalar_lea.vmem %s1226_s10, %s878_s15 }
  0x36   :  { %102 = vst.msk [vmem:[%s1226_s10 + $0x2] sm:$0x1] %vm83_vm3, %v94_v31  ;;  %103 = vst.msk [vmem:[%s1226_s10 + $0x3] sm:$0x1] %vm83_vm3, %v95_v32 }
  0x37   :  { %104 = vst.msk [vmem:[%s1226_s10 + $0x4] sm:$0x1] %vm83_vm3, %v96_v33  ;;  %105 = vst.msk [vmem:[%s1226_s10 + $0x5] sm:$0x1] %vm83_vm3, %v97_v34  ;;  %v80_v60 = vld [vmem:[%s1219_s3 + $0x5] sm:$0x1] }
  0x38   :  { %106 = vst.msk [vmem:[%s1226_s10 + $0x6] sm:$0x1] %vm83_vm3, %v98_v35  ;;  %107 = vst.msk [vmem:[%s1226_s10 + $0x7] sm:$0x1] %vm83_vm3, %v99_v36  ;;  %v81_v61 = vld [vmem:[%s1219_s3 + $0x6] sm:$0x1] }
  0x39   :  { %v82_v62 = vld [vmem:[%s1219_s3 + $0x7] sm:$0x1]  ;;  %v387_v36 = vld [vmem:[%s1222_s6 + $0x8] sm:$0xff] }
  0x3a   :  { %86 = vst.msk [vmem:[%s1225_s9 + $0x2] sm:$0x1] %vm83_vm3, %v77_v57  ;;  %87 = vst.msk [vmem:[%s1225_s9 + $0x3] sm:$0x1] %vm83_vm3, %v78_v58  ;;  %v386_v35 = vld [vmem:[%s1222_s6] sm:$0xff] }
  0x3b   :  { %v257_v28 = vld [vmem:[#allocation2] sm:$0xf]  ;;  %88 = vst.msk [vmem:[%s1225_s9 + $0x4] sm:$0x1] %vm83_vm3, %v79_v59  ;;  %89 = vst.msk [vmem:[%s1225_s9 + $0x5] sm:$0x1] %vm83_vm3, %v80_v60 }
  0x3c   :  { %605 = vmatmul.mubr.msk.f32.vlgmr.msra.gmra.mrb[0].mxu0 %vm269_vm2, %v257_v28  ;;  %90 = vst.msk [vmem:[%s1225_s9 + $0x6] sm:$0x1] %vm83_vm3, %v81_v61  ;;  %91 = vst.msk [vmem:[%s1225_s9 + $0x7] sm:$0x1] %vm83_vm3, %v82_v62 }
  0x3f   :  { %v564_v37 = vld [vmem:[%s147_s26] ss:$0 sm:$0xff]  ;;  %s470_s26 = scalar_lea.vmem %s1226_s10, %s868_s30 }
  0x40   :  { %154 = vrot.lane.b32.xlu1 %v564_v37, %s680_s5  ;;  %v567_v38 = vld [vmem:[%s166_s29] ss:$0 sm:$0xff]  ;;  %s163_s29 = scalar_lea.vmem %s1219_s3, %s878_s15  ;;  %v625_v37 = vpack.c.bf16 %v387_v36, %v386_v35 }
  0x41   :  { %v568_v39 = vld [vmem:[%s180_s13] ss:$0 sm:$0xff]  ;;  %s507_s13 = scalar_lea.vmem %s1224_s8, %s882_s17 }
  0x42   :  { %v571_v40 = vld [vmem:[%s199_s20] ss:$0 sm:$0xff]  ;;  %626 = vmatpush3.bf16.msra.mxu1 %v625_v37 }
  0x43   :  { %v572_v41 = vld [vmem:[%s213_s23] ss:$0 sm:$0xff]  ;;  %s682_s23 = smov 112   ;;  %627 = vmatprep.subr.bf16.mxu1 %v677_v3 }
  0x44   :  { %173 = vrot.lane.b32.xlu1 %v567_v38, %s680_s5  ;;  %v575_v50 = vld [vmem:[%s232_s2] ss:$0 sm:$0xff]  ;;  %s477_s2 = scalar_lea.vmem %s1225_s9, %s878_s15  ;;  %v388_v38 = vld [vmem:[%s1222_s6 + $0x10] sm:$0xff] }
  0x45   :  { %v576_v51 = vld [vmem:[%s246_s19] ss:$0 sm:$0xff]  ;;  %s488_s19 = scalar_lea.vmem %s1225_s9, %s880_s16 }
  0x46   :  { %v563_v52 = vld [vmem:[%s132_s22] ss:$0 sm:$0xff]  ;;  %s499_s22 = scalar_lea.vmem %s1225_s9, %s882_s17 }
  0x47   :  { %v145_v1 = vld [vmem:[%s144_s1] sm:$0x1]  ;;  %s464_s1 = scalar_lea.vmem %s1225_s9, %s868_s30 }
  0x48   :  { %187 = vrot.lane.b32.xlu1 %v568_v39, %s680_s5  ;;  %v164_v2 = vld [vmem:[%s163_s29] sm:$0x1]  ;;  %146 = vst.msk [vmem:[#allocation4] sm:$0x1] %vm83_vm3, %v145_v1  ;;  %v389_v39 = vld [vmem:[%s1222_s6 + $0x18] sm:$0xff] }
  0x49   :  { %165 = vst.msk [vmem:[#allocation3 + $0x1] sm:$0x1] %vm83_vm3, %v164_v2  ;;  %v197_v5 = vld [vmem:[%s196_s18] sm:$0x1] }
  0x4a   :  { %v211_v6 = vld [vmem:[%s210_s21] sm:$0x1]  ;;  %198 = vst.msk [vmem:[#allocation3 + $0x2] sm:$0x1] %vm83_vm3, %v197_v5 }
  0x4b   :  { %v230_v7 = vld [vmem:[%s229_s24] sm:$0x1]  ;;  %212 = vst.msk [vmem:[#allocation4 + $0x2] sm:$0x1] %vm83_vm3, %v211_v6 }
  0x4c   :  { %206 = vrot.lane.b32.xlu1 %v571_v40, %s680_s5  ;;  %231 = vst.msk [vmem:[#allocation3 + $0x3] sm:$0x1] %vm83_vm3, %v230_v7  ;;  %v244_v9 = vld [vmem:[%s243_s27] sm:$0x1]  ;;  %v628_v40 = vpack.c.bf16 %v389_v39, %v388_v38  ;;  %s493_s27 = scalar_lea.vmem %s1227_s11, %s880_s16 }
  0x4d   :  { %v130_v10 = vld [vmem:[%s129_s12] sm:$0x1]  ;;  %245 = vst.msk [vmem:[#allocation4 + $0x3] sm:$0x1] %vm83_vm3, %v244_v9 }
  0x4e   :  { %131 = vst.msk [vmem:[#allocation3] sm:$0x1] %vm83_vm3, %v130_v10  ;;  %629 = vmatpush3.bf16.msra.mxu1 %v628_v40 }
  0x50   :  { %220 = vrot.lane.b32.xlu1 %v572_v41, %s680_s5 }
  0x54   :  { %239 = vrot.lane.b32.xlu1 %v575_v50, %s680_s5 }
  0x58   :  { %253 = vrot.lane.b32.xlu1 %v576_v51, %s680_s5 }
  0xb2   :  { %v155_v54 = vpop.permute.xlu1 %154 }
  0xb3   :  { %157 = vst.msk [vmem:[#allocation4] sm:$0x1] %vm142_vm5, %v155_v54 }
  0xb6   :  { %v174_v63 = vpop.permute.xlu1 %173 }
  0xb7   :  { %176 = vst.msk [vmem:[#allocation3 + $0x1] sm:$0x1] %vm142_vm5, %v174_v63 }
  0xba   :  { %v188_v0 = vpop.permute.xlu1 %187 }
  0xbe   :  { %v207_v8 = vpop.permute.xlu1 %206 }
  0xbf   :  { %209 = vst.msk [vmem:[#allocation3 + $0x2] sm:$0x1] %vm142_vm5, %v207_v8 }
  0xc2   :  { %v221_v11 = vpop.permute.xlu1 %220 }
  0xc3   :  { %223 = vst.msk [vmem:[#allocation4 + $0x2] sm:$0x1] %vm142_vm5, %v221_v11 }
  0xc6   :  { %v240_v12 = vpop.permute.xlu1 %239 }
  0xc7   :  { %242 = vst.msk [vmem:[#allocation3 + $0x3] sm:$0x1] %vm142_vm5, %v240_v12 }
  0xca   :  { %v254_v13 = vpop.permute.xlu1 %253 }
  0xcb   :  { %256 = vst.msk [vmem:[#allocation4 + $0x3] sm:$0x1] %vm142_vm5, %v254_v13 }
 0x10f   :  { %v339_v43 = vpop.f32.mrb[0].mxu0 }
 0x110   :  { %v340_v44 = vadd.f32 %v577_v42, %v339_v43  ;;  %v606_v45 = vpop.f32.mrb[1].mxu0 }
 0x112   :  { %v343_v47 = vmax.f32 %v340_v44, 0.0 }
 0x114   :  { %v348_v48 = vmul.f32 %v579_v46, %v343_v47 }
 0x116   :  { %v350_v49 = vsel %vm349_vm4, %v348_v48, 0.0 }
 0x117   :  { %351 = vadd.xlane.f32.xlu0 %v350_v49 }
 0x12d   :  { %139 = vrot.lane.b32.xlu0 %v563_v52, %s680_s5  ;;  %s177_s5 = scalar_lea.vmem %s1219_s3, %s963_s25  ;;  %s491_s3 = scalar_lea.vmem %s1226_s10, %s880_s16 }
 0x12e   :  { %v178_v4 = vld [vmem:[%s177_s5] sm:$0x1]  ;;  %s504_s25 = scalar_lea.vmem %s1227_s11, %s882_s17  ;;  %s496_s5 = scalar_lea.vmem %s1224_s8, %s880_s16 }
 0x12f   :  { %179 = vst.msk [vmem:[#allocation4 + $0x1] sm:$0x1] %vm83_vm3, %v178_v4 }
 0x130   :  { %190 = vst.msk [vmem:[#allocation4 + $0x1] sm:$0x1] %vm142_vm5, %v188_v0 }
 0x137   :  { %v364_v22 = vld [vmem:[#allocation4] sm:$0xf] }
 0x1a4   :  { %v352_v15 = vpop.xlane.xlu0 %351 }
 0x1a5   :  { %v357_v16 = vadd.f32 %v580_v14, %v352_v15 }
 0x1a7   :  { %v581_v17 = vmul.f32 -1.442695, %v357_v16 }
 0x1a8   :  { %v140_v18 = vpop.permute.xlu0 %139 }
 0x1a9   :  { %639 = vpow2.f32 %v581_v17  ;;  %143 = vst.msk [vmem:[#allocation3] sm:$0x1] %vm142_vm5, %v140_v18 }
 0x1b0   :  { %v365_v23 = vld [vmem:[#allocation3] sm:$0xf] }
 0x1b1   :  { %v366_v24 = vsub.f32 %v365_v23, %v364_v22 }
 0x1b3   :  { %v640_v19 = vpop.eup %639 }
 0x1b4   :  { %v361_v20 = vadd.f32 1.0, %v640_v19 }
 0x1b6   :  { %641 = vrcp.f32 %v361_v20 }
 0x1c0   :  { %v642_v21 = vpop.eup %641 }
 0x1c1   :  { %369 = vperm.xlu0 %638, %v642_v21  }
 0x240   :  { %v370_v25 = vpop.permute.xlu0 %369 }
 0x241   :  { %v372_v26 = vmul.f32 %v370_v25, %v366_v24 }
 0x243   :  { %v373_v27 = vadd.f32 %v372_v26, %v364_v22 }
 0x245   :  { %v375_v28 = vsel %vm374_vm6, %v373_v27, -inf  ;;  %465 = vst.msk [vmem:[%s464_s1] sm:$0x1] %vm83_vm3, %v373_v27  ;;  %s485_s1 = scalar_lea.vmem %s1224_s8, %s878_s15 }
 0x246   :  { %376 = vmax.xlane.f32.xlu1 %v375_v28  ;;  %479 = vst.msk [vmem:[%s477_s2 - $0x1] sm:$0x2] %vm478_vm7, %v373_v27 }
 0x247   :  { %490 = vst.msk [vmem:[%s488_s19 - $0x2] sm:$0x4] %vm489_vm8, %v373_v27 }
 0x248   :  { %501 = vst.msk [vmem:[%s499_s22 - $0x3] sm:$0x8] %vm500_vm9, %v373_v27  ;;  %s472_s22 = scalar_lea.vmem %s1227_s11, %s868_s30 }
 0x257   :  { %467 = vrot.lane.b32.xlu1 %v373_v27, %s682_s23 }
 0x2d3   :  { %v377_v29 = vpop.xlane.xlu1 %376 }
 0x2d4   :  { %v378_v30 = vsub.f32 %v373_v27, %v377_v29 }
 0x2d6   :  { %v379_v31 = vmul.f32 1.442695, %v378_v30 }
 0x2d7   :  { %v468_v32 = vpop.permute.xlu1 %467 }
 0x2d8   :  { %643 = vpow2.f32 %v379_v31  ;;  %471 = vst.msk [vmem:[%s470_s26] sm:$0x1] %vm83_vm3, %v468_v32 }
 0x2d9   :  { %481 = vst.msk [vmem:[%s480_s4 - $0x1] sm:$0x2] %vm478_vm7, %v468_v32 }
 0x2da   :  { %492 = vst.msk [vmem:[%s491_s3 - $0x2] sm:$0x4] %vm489_vm8, %v468_v32 }
 0x2db   :  { %503 = vst.msk [vmem:[%s502_s28 - $0x3] sm:$0x8] %vm500_vm9, %v468_v32 }
 0x2e2   :  { %v644_v33 = vpop.eup %643 }
 0x2e3   :  { %v381_v34 = vsel %vm374_vm6, %v644_v33, 0.0 }
 0x2e4   :  { %382 = vadd.xlane.f32.xlu0 %v381_v34 }
 0x371   :  { %v383_v41 = vpop.xlane.xlu0 %382 }
 0x372   :  { %645 = vrcp.f32 %v383_v41 }
 0x37c   :  { %v646_v42 = vpop.eup %645 }
 0x37d   :  { %v385_v3 = vmul.f32 %v646_v42, %v644_v33 }
 0x37f   :  { %473 = vst.msk [vmem:[%s472_s22] sm:$0x1] %vm66_vm1, %v385_v3  ;;  %616 = vmatmul.mubr.msk.f32.vlgmr.msra.gmra.mrb[0].mxu1 %vm269_vm2, %v385_v3 }
 0x380   :  { %484 = vst.msk [vmem:[%s482_s0 - $0x1] sm:$0x2] %vm483_vm10, %v385_v3 }
 0x381   :  { %495 = vst.msk [vmem:[%s493_s27 - $0x2] sm:$0x4] %vm494_vm11, %v385_v3 }
 0x382   :  { %506 = vst.msk [vmem:[%s504_s25 - $0x3] sm:$0x8] %vm505_vm12, %v385_v3 }
 0x452   :  { %v459_v43 = vpop.f32.mrb[0].mxu1 }
 0x453   :  { %475 = vst.msk [vmem:[%s474_s14] sm:$0x1] %vm66_vm1, %v459_v43  ;;  %v617_v44 = vpop.f32.mrb[1].mxu1 }
 0x454   :  { %486 = vst.msk [vmem:[%s485_s1 - $0x1] sm:$0x2] %vm483_vm10, %v459_v43 }
 0x455   :  { %497 = vst.msk [vmem:[%s496_s5 - $0x2] sm:$0x4] %vm494_vm11, %v459_v43 }
 0x456   :  { %508 = vst.msk [vmem:[%s507_s13 - $0x3] sm:$0x8] %vm505_vm12, %v459_v43 }
 0x457   :  { %525 = vsyncpa [#allocation6], 1 }
 0x458   :  { %526 = vsyncpa [#allocation8], 1 }

</bundles_post_ra>
